<compile_context>
chip_gen: v7x
topology: tpu7x:2x2x1
jax: 0.10.0
libtpu: 0.0.40
codegen_flags: <defaults>
</compile_context>

<pallas_src>
import functools

import jax
import jax.numpy as jnp
from jax.experimental import pallas as pl
from jax.experimental.pallas import tpu as pltpu

NEG_SLOPE = 0.01  # nn.LeakyReLU() default negative_slope


# ----------------------------- small helpers --------------------------------

def _round_up(x, m):
    return (x + m - 1) // m * m


def _leaky_relu(v):
    # slope < 1  =>  max(v, slope*v) == LeakyReLU(v); 2 VALU ops vs cmp+select+mul.
    return jnp.maximum(v, NEG_SLOPE * v)


def _tpu_generation():
    try:
        kind = jax.devices()[0].device_kind.lower()
    except Exception:
        return None
    for gen in ("v7", "v6", "v5", "v4"):
        if gen in kind:
            return gen
    return None


def _vmem_budget_bytes(gen):
    if gen == "v7":
        return 48 << 20      # 64 MiB physical per TensorCore -> leave headroom
    if gen in ("v4", "v5", "v6"):
        return 100 << 20     # 128 MiB physical
    return 64 << 20          # unknown generation: stay conservative


def _default_use_bf16():
    # v6e / v7x MXUs run bf16 at full rate; f32 matmul is emulated via multiple passes.
    return _tpu_generation() in ("v6", "v7")


def _resident_bytes(hp, w_itemsize):
    # 2 single-buffered weight blocks + 2 f32 bias rows.
    return 2 * hp * hp * w_itemsize + 2 * hp * 4


def _per_row_bytes(hp):
    # Streamed x / out tiles are double-buffered f32, plus ~4 (block_m, Hp) f32-equivalent
    # intermediates (matmul-operand cast, fc1 activation, fc2 pre-activation, store temp).
    return hp * (2 * 4 + 2 * 4 + 4 * 4)


def _pick_block_m(m, hp, w_itemsize, vmem_budget):
    avail = vmem_budget - _resident_bytes(hp, w_itemsize)
    bm = max(avail // _per_row_bytes(hp), 8)
    cap = 2048 if hp <= 512 else 512      # small H: amortize the ~0.35us/step overhead
    bm = max(8, min((bm // 8) * 8, cap))
    if bm >= m:
        if m >= 16:
            # >=2 grid steps so the "parallel" batch axis shards across both v7x cores.
            bm = _round_up(pl.cdiv(m, 2), 8)
        else:
            bm = m                        # single full-extent block (legal for any M)
    return int(bm)


# ------------------------------- the kernel ---------------------------------

def _residual_block_kernel(x_ref, w1_ref, b1_ref, w2_ref, b2_ref, o_ref):
    wdt = w1_ref.dtype                    # matmul operand dtype (f32 or bf16)
    x = x_ref[...]                        # (block_m, Hp) f32; kept for the residual add
    # fc1 + LeakyReLU.  Weights are pre-transposed to (in, out): plain contraction.
    h = jnp.dot(x.astype(wdt), w1_ref[...], preferred_element_type=jnp.float32)
    h = _leaky_relu(h + b1_ref[...])
    # fc2 + bias + residual (original f32 x) + LeakyReLU.
    y = jnp.dot(h.astype(wdt), w2_ref[...], preferred_element_type=jnp.float32)
    y = y + b2_ref[...] + x
    o_ref[...] = _leaky_relu(y).astype(o_ref.dtype)


@functools.partial(
    jax.jit, static_argnames=("block_m", "vmem_limit_bytes", "resident_buffered"))
def _residual_block_call(x, w1t, b1r, w2t, b2r, *, block_m, vmem_limit_bytes,
                         resident_buffered):
    m, h = x.shape
    hp = w1t.shape[0]
    xp = x if hp == h else jnp.pad(x, ((0, 0), (0, hp - h)))
    # Constant-index (resident) operands gain nothing from double-buffering.
    resident_mode = pl.Buffered(1) if resident_buffered else None

    out = pl.pallas_call(
        _residual_block_kernel,
        out_shape=jax.ShapeDtypeStruct((m, hp), x.dtype),
        grid_spec=pltpu.PrefetchScalarGridSpec(
            num_scalar_prefetch=0,
            grid=(pl.cdiv(m, block_m),),
            in_specs=[
                pl.BlockSpec((block_m, hp), lambda i: (i, 0)),                           # x
                pl.BlockSpec((hp, hp), lambda i: (0, 0), pipeline_mode=resident_mode),   # W1.T
                pl.BlockSpec((1, hp), lambda i: (0, 0), pipeline_mode=resident_mode),    # b1
                pl.BlockSpec((hp, hp), lambda i: (0, 0), pipeline_mode=resident_mode),   # W2.T
                pl.BlockSpec((1, hp), lambda i: (0, 0), pipeline_mode=resident_mode),    # b2
            ],
            out_specs=pl.BlockSpec((block_m, hp), lambda i: (i, 0)),
        ),
        compiler_params=pltpu.CompilerParams(
            dimension_semantics=("parallel",),   # batch rows are independent (megacore)
            vmem_limit_bytes=vmem_limit_bytes,
        ),
    )(xp, w1t, b1r, w2t, b2r)
    return out if hp == h else out[:, :h]


# ------------------------------ public wrappers ------------------------------

def prepare_params(w1, b1, w2, b2, *, use_bf16_matmul=None):
    """One-time weight prep: transpose to (in, out), cast for the MXU, pad H to 128.

    Call this once and reuse the result across forward calls; it is the only place
    the weights are transposed / cast, so the hot path never re-streams them.
    """
    if use_bf16_matmul is None:
        use_bf16_matmul = _default_use_bf16()
    mm_dtype = jnp.bfloat16 if use_bf16_matmul else jnp.float32
    h = w1.shape[0]
    hp = _round_up(h, 128)                 # keep the output store lane-dense

    def prep_w(w):
        wt = jnp.asarray(w, jnp.float32).T            # PyTorch (out, in) -> (in, out)
        if hp != h:
            wt = jnp.pad(wt, ((0, hp - h), (0, hp - h)))
        return wt.astype(mm_dtype)

    def prep_b(b):
        b = jnp.asarray(b, jnp.float32)
        if hp != h:
            b = jnp.pad(b, (0, hp - h))
        return b.reshape(1, hp)                        # biases stay f32 (post-matmul add)

    return prep_w(w1), prep_b(b1), prep_w(w2), prep_b(b2)


def residual_block_apply(x, w1t, b1r, w2t, b2r, *, block_m=None):
    """Forward pass with pre-prepared (transposed / cast / padded) parameters."""
    m, _ = x.shape
    hp = w1t.shape[0]
    budget = _vmem_budget_bytes(_tpu_generation())
    w_itemsize = jnp.dtype(w1t.dtype).itemsize
    if block_m is None:
        block_m = _pick_block_m(m, hp, w_itemsize, budget)
    footprint = _resident_bytes(hp, w_itemsize) + _per_row_bytes(hp) * block_m
    vmem_limit = int(min(budget, max(footprint + (8 << 20), 32 << 20)))
    # TODO(synk): K-tile the weights with an f32 accumulator once 2*H^2*itemsize no longer
    # fits the per-generation VMEM budget (shrinking block_m alone can't save that case).
    kwargs = dict(block_m=int(block_m), vmem_limit_bytes=vmem_limit)
    try:
        return _residual_block_call(x, w1t, b1r, w2t, b2r,
                                    resident_buffered=True, **kwargs)
    except Exception:
        # Pallas builds without Buffered() support at the pallas_call level: fall back to
        # default (double-buffered) resident operands; correctness is unchanged.
        return _residual_block_call(x, w1t, b1r, w2t, b2r,
                                    resident_buffered=False, **kwargs)


def residual_block(x, w1, b1, w2, b2, *, use_bf16_matmul=None, block_m=None):
    """Convenience one-shot wrapper; w1/w2 in PyTorch (out, in) layout, b1/b2 (H,)."""
    params = prepare_params(w1, b1, w2, b2, use_bf16_matmul=use_bf16_matmul)
    return residual_block_apply(x, *params, block_m=block_m)


def reference(x, w1, b1, w2, b2):
    def lrelu(v):
        return jnp.where(v > 0, v, NEG_SLOPE * v)

    h = lrelu(x @ w1.T + b1)
    y = h @ w2.T + b2 + x
    return lrelu(y)


# ----------------------------------- test ------------------------------------

if __name__ == "__main__":
    batch = 32
    hidden = 128  # hidden_dim of the ResidualBlock

    key = jax.random.PRNGKey(0)
    kx, kw1, kb1, kw2, kb2 = jax.random.split(key, 5)

    # Deterministic init mimicking nn.Linear default: U(-1/sqrt(fan_in), 1/sqrt(fan_in))
    bound = float(1.0 / (hidden ** 0.5))
    x = jax.random.normal(kx, (batch, hidden), dtype=jnp.float32)
    w1 = jax.random.uniform(kw1, (hidden, hidden), jnp.float32, -bound, bound)
    b1 = jax.random.uniform(kb1, (hidden,), jnp.float32, -bound, bound)
    w2 = jax.random.uniform(kw2, (hidden, hidden), jnp.float32, -bound, bound)
    b2 = jax.random.uniform(kb2, (hidden,), jnp.float32, -bound, bound)

    ref = reference(x, w1, b1, w2, b2)

    # Full-precision path: prepare weights ONCE, reuse across calls.
    params_f32 = prepare_params(w1, b1, w2, b2, use_bf16_matmul=False)
    out = residual_block_apply(x, *params_f32)
    jax.block_until_ready(out)
    assert out.shape == (batch, hidden)
    assert jnp.allclose(out, ref, atol=1e-5, rtol=1e-5), "f32 kernel mismatch vs reference"

    # bf16 MXU path (default on v6e/v7x): looser tolerance vs the f32 reference.
    params_bf16 = prepare_params(w1, b1, w2, b2, use_bf16_matmul=True)
    out_bf16 = residual_block_apply(x, *params_bf16)
    jax.block_until_ready(out_bf16)
    assert jnp.allclose(out_bf16, ref, atol=3e-2, rtol=3e-2), "bf16 kernel mismatch vs reference"

    # Convenience wrapper with generation-dependent defaults.
    out_auto = residual_block(x, w1, b1, w2, b2)
    jax.block_until_ready(out_auto)
    assert jnp.allclose(out_auto, ref, atol=3e-2, rtol=3e-2), "auto-path mismatch vs reference"

    print("KERNEL_OK")
</pallas_src>

<mosaic_0001>
module attributes {stable_mosaic.version = 11 : i64} {
  func.func @_residual_block_kernel(%arg0: i32, %arg1: memref<16x128xf32, #tpu.memory_space<vmem>>, %arg2: memref<128x128xf32, #tpu.memory_space<vmem>>, %arg3: memref<1x128xf32, #tpu.memory_space<vmem>>, %arg4: memref<128x128xf32, #tpu.memory_space<vmem>>, %arg5: memref<1x128xf32, #tpu.memory_space<vmem>>, %arg6: memref<16x128xf32, #tpu.memory_space<vmem>>) attributes {dimension_semantics = [#tpu.dimension_semantics<parallel>], iteration_bounds = array<i64: 2>, scalar_prefetch = 0 : i64, scratch_operands = 0 : i64, tpu.core_type = #tpu.core_type<tc>, window_params = [{transform_indices = @transform_0, window_bounds = array<i64: 16, 128>}, {pipeline_mode = #tpu.pipeline_mode<synchronous>, transform_indices = @transform_1, window_bounds = array<i64: 128, 128>}, {pipeline_mode = #tpu.pipeline_mode<synchronous>, transform_indices = @transform_2, window_bounds = array<i64: 1, 128>}, {pipeline_mode = #tpu.pipeline_mode<synchronous>, transform_indices = @transform_3, window_bounds = array<i64: 128, 128>}, {pipeline_mode = #tpu.pipeline_mode<synchronous>, transform_indices = @transform_4, window_bounds = array<i64: 1, 128>}, {transform_indices = @transform_5, window_bounds = array<i64: 16, 128>}]} {
    %c0 = arith.constant 0 : index
    %c0_0 = arith.constant 0 : index
    %0 = vector.load %arg1[%c0, %c0_0] : memref<16x128xf32, #tpu.memory_space<vmem>>, vector<16x128xf32>
    %c0_1 = arith.constant 0 : index
    %c0_2 = arith.constant 0 : index
    %1 = vector.load %arg2[%c0_1, %c0_2] : memref<128x128xf32, #tpu.memory_space<vmem>>, vector<128x128xf32>
    %cst = arith.constant dense<0.000000e+00> : vector<16x128xf32>
    %2 = tpu.matmul %0, %1, %cst {dimension_numbers = #tpu.dot_dimension_numbers<[1], [0], [0], [1], [0, 0, 1, 1], [], []>} : vector<16x128xf32>, vector<128x128xf32>, vector<16x128xf32> -> vector<16x128xf32>
    %c0_3 = arith.constant 0 : index
    %c0_4 = arith.constant 0 : index
    %3 = vector.load %arg3[%c0_3, %c0_4] : memref<1x128xf32, #tpu.memory_space<vmem>>, vector<1x128xf32>
    %4 = vector.broadcast %3 : vector<1x128xf32> to vector<16x128xf32>
    %5 = arith.addf %2, %4 : vector<16x128xf32>
    %cst_5 = arith.constant 0.00999999977 : f32
    %6 = vector.broadcast %cst_5 : f32 to vector<16x128xf32>
    %7 = arith.mulf %6, %5 : vector<16x128xf32>
    %8 = arith.maximumf %5, %7 : vector<16x128xf32>
    %c0_6 = arith.constant 0 : index
    %c0_7 = arith.constant 0 : index
    %9 = vector.load %arg4[%c0_6, %c0_7] : memref<128x128xf32, #tpu.memory_space<vmem>>, vector<128x128xf32>
    %cst_8 = arith.constant dense<0.000000e+00> : vector<16x128xf32>
    %10 = tpu.matmul %8, %9, %cst_8 {dimension_numbers = #tpu.dot_dimension_numbers<[1], [0], [0], [1], [0, 0, 1, 1], [], []>} : vector<16x128xf32>, vector<128x128xf32>, vector<16x128xf32> -> vector<16x128xf32>
    %c0_9 = arith.constant 0 : index
    %c0_10 = arith.constant 0 : index
    %11 = vector.load %arg5[%c0_9, %c0_10] : memref<1x128xf32, #tpu.memory_space<vmem>>, vector<1x128xf32>
    %12 = vector.broadcast %11 : vector<1x128xf32> to vector<16x128xf32>
    %13 = arith.addf %10, %12 : vector<16x128xf32>
    %14 = arith.addf %13, %0 : vector<16x128xf32>
    %cst_11 = arith.constant 0.00999999977 : f32
    %15 = vector.broadcast %cst_11 : f32 to vector<16x128xf32>
    %16 = arith.mulf %15, %14 : vector<16x128xf32>
    %17 = arith.maximumf %14, %16 : vector<16x128xf32>
    %c0_12 = arith.constant 0 : index
    %c0_13 = arith.constant 0 : index
    %18 = vector.load %arg6[%c0_12, %c0_13] : memref<16x128xf32, #tpu.memory_space<vmem>>, vector<16x128xf32>
    tpu.vector_store %arg6[%c0_12, %c0_13], %17 {strides = array<i32>} : memref<16x128xf32, #tpu.memory_space<vmem>>, vector<16x128xf32>,
    return
  }
  func.func @transform_0(%arg0: i32) -> (i32, i32) {
    %c0_i32 = arith.constant 0 : i32
    %c0_i32_0 = arith.constant 0 : i32
    return %arg0, %c0_i32 : i32, i32
  }
  func.func @transform_1(%arg0: i32) -> (i32, i32) {
    %c0_i32 = arith.constant 0 : i32
    %c0_i32_0 = arith.constant 0 : i32
    %c0_i32_1 = arith.constant 0 : i32
    return %c0_i32, %c0_i32_0 : i32, i32
  }
  func.func @transform_2(%arg0: i32) -> (i32, i32) {
    %c0_i32 = arith.constant 0 : i32
    %c0_i32_0 = arith.constant 0 : i32
    %c0_i32_1 = arith.constant 0 : i32
    return %c0_i32, %c0_i32_0 : i32, i32
  }
  func.func @transform_3(%arg0: i32) -> (i32, i32) {
    %c0_i32 = arith.constant 0 : i32
    %c0_i32_0 = arith.constant 0 : i32
    %c0_i32_1 = arith.constant 0 : i32
    return %c0_i32, %c0_i32_0 : i32, i32
  }
  func.func @transform_4(%arg0: i32) -> (i32, i32) {
    %c0_i32 = arith.constant 0 : i32
    %c0_i32_0 = arith.constant 0 : i32
    %c0_i32_1 = arith.constant 0 : i32
    return %c0_i32, %c0_i32_0 : i32, i32
  }
  func.func @transform_5(%arg0: i32) -> (i32, i32) {
    %c0_i32 = arith.constant 0 : i32
    %c0_i32_0 = arith.constant 0 : i32
    return %arg0, %c0_i32 : i32, i32
  }
}

module attributes {stable_mosaic.version = 11 : i64} {
  func.func @_residual_block_kernel(%arg0: i32, %arg1: memref<16x128xf32, #tpu.memory_space<vmem>>, %arg2: memref<128x128xf32, #tpu.memory_space<vmem>>, %arg3: memref<1x128xf32, #tpu.memory_space<vmem>>, %arg4: memref<128x128xf32, #tpu.memory_space<vmem>>, %arg5: memref<1x128xf32, #tpu.memory_space<vmem>>, %arg6: memref<16x128xf32, #tpu.memory_space<vmem>>) attributes {dimension_semantics = [#tpu.dimension_semantics<parallel>], iteration_bounds = array<i64: 2>, scalar_prefetch = 0 : i64, scratch_operands = 0 : i64, tpu.core_type = #tpu.core_type<tc>, window_params = [{transform_indices = @transform_0, window_bounds = array<i64: 16, 128>}, {pipeline_mode = #tpu.pipeline_mode<synchronous>, transform_indices = @transform_1, window_bounds = array<i64: 128, 128>}, {pipeline_mode = #tpu.pipeline_mode<synchronous>, transform_indices = @transform_2, window_bounds = array<i64: 1, 128>}, {pipeline_mode = #tpu.pipeline_mode<synchronous>, transform_indices = @transform_3, window_bounds = array<i64: 128, 128>}, {pipeline_mode = #tpu.pipeline_mode<synchronous>, transform_indices = @transform_4, window_bounds = array<i64: 1, 128>}, {transform_indices = @transform_5, window_bounds = array<i64: 16, 128>}]} {
    %c0 = arith.constant 0 : index
    %c0_0 = arith.constant 0 : index
    %0 = vector.load %arg1[%c0, %c0_0] : memref<16x128xf32, #tpu.memory_space<vmem>>, vector<16x128xf32>
    %c0_1 = arith.constant 0 : index
    %c0_2 = arith.constant 0 : index
    %1 = vector.load %arg2[%c0_1, %c0_2] : memref<128x128xf32, #tpu.memory_space<vmem>>, vector<128x128xf32>
    %cst = arith.constant dense<0.000000e+00> : vector<16x128xf32>
    %2 = tpu.matmul %0, %1, %cst {dimension_numbers = #tpu.dot_dimension_numbers<[1], [0], [0], [1], [0, 0, 1, 1], [], []>} : vector<16x128xf32>, vector<128x128xf32>, vector<16x128xf32> -> vector<16x128xf32>
    %c0_3 = arith.constant 0 : index
    %c0_4 = arith.constant 0 : index
    %3 = vector.load %arg3[%c0_3, %c0_4] : memref<1x128xf32, #tpu.memory_space<vmem>>, vector<1x128xf32>
    %4 = vector.broadcast %3 : vector<1x128xf32> to vector<16x128xf32>
    %5 = arith.addf %2, %4 : vector<16x128xf32>
    %cst_5 = arith.constant 0.00999999977 : f32
    %6 = vector.broadcast %cst_5 : f32 to vector<16x128xf32>
    %7 = arith.mulf %6, %5 : vector<16x128xf32>
    %8 = arith.maximumf %5, %7 : vector<16x128xf32>
    %c0_6 = arith.constant 0 : index
    %c0_7 = arith.constant 0 : index
    %9 = vector.load %arg4[%c0_6, %c0_7] : memref<128x128xf32, #tpu.memory_space<vmem>>, vector<128x128xf32>
    %cst_8 = arith.constant dense<0.000000e+00> : vector<16x128xf32>
    %10 = tpu.matmul %8, %9, %cst_8 {dimension_numbers = #tpu.dot_dimension_numbers<[1], [0], [0], [1], [0, 0, 1, 1], [], []>} : vector<16x128xf32>, vector<128x128xf32>, vector<16x128xf32> -> vector<16x128xf32>
    %c0_9 = arith.constant 0 : index
    %c0_10 = arith.constant 0 : index
    %11 = vector.load %arg5[%c0_9, %c0_10] : memref<1x128xf32, #tpu.memory_space<vmem>>, vector<1x128xf32>
    %12 = vector.broadcast %11 : vector<1x128xf32> to vector<16x128xf32>
    %13 = arith.addf %10, %12 : vector<16x128xf32>
    %14 = arith.addf %13, %0 : vector<16x128xf32>
    %cst_11 = arith.constant 0.00999999977 : f32
    %15 = vector.broadcast %cst_11 : f32 to vector<16x128xf32>
    %16 = arith.mulf %15, %14 : vector<16x128xf32>
    %17 = arith.maximumf %14, %16 : vector<16x128xf32>
    %c0_12 = arith.constant 0 : index
    %c0_13 = arith.constant 0 : index
    %18 = vector.load %arg6[%c0_12, %c0_13] : memref<16x128xf32, #tpu.memory_space<vmem>>, vector<16x128xf32>
    tpu.vector_store %arg6[%c0_12, %c0_13], %17 {strides = array<i32>} : memref<16x128xf32, #tpu.memory_space<vmem>>, vector<16x128xf32>,
    return
  }
  func.func @transform_0(%arg0: i32) -> (i32, i32) {
    %c0_i32 = arith.constant 0 : i32
    %c0_i32_0 = arith.constant 0 : i32
    return %arg0, %c0_i32 : i32, i32
  }
  func.func @transform_1(%arg0: i32) -> (i32, i32) {
    %c0_i32 = arith.constant 0 : i32
    %c0_i32_0 = arith.constant 0 : i32
    %c0_i32_1 = arith.constant 0 : i32
    return %c0_i32, %c0_i32_0 : i32, i32
  }
  func.func @transform_2(%arg0: i32) -> (i32, i32) {
    %c0_i32 = arith.constant 0 : i32
    %c0_i32_0 = arith.constant 0 : i32
    %c0_i32_1 = arith.constant 0 : i32
    return %c0_i32, %c0_i32_0 : i32, i32
  }
  func.func @transform_3(%arg0: i32) -> (i32, i32) {
    %c0_i32 = arith.constant 0 : i32
    %c0_i32_0 = arith.constant 0 : i32
    %c0_i32_1 = arith.constant 0 : i32
    return %c0_i32, %c0_i32_0 : i32, i32
  }
  func.func @transform_4(%arg0: i32) -> (i32, i32) {
    %c0_i32 = arith.constant 0 : i32
    %c0_i32_0 = arith.constant 0 : i32
    %c0_i32_1 = arith.constant 0 : i32
    return %c0_i32, %c0_i32_0 : i32, i32
  }
  func.func @transform_5(%arg0: i32) -> (i32, i32) {
    %c0_i32 = arith.constant 0 : i32
    %c0_i32_0 = arith.constant 0 : i32
    return %arg0, %c0_i32 : i32, i32
  }
}

</mosaic_0001>

<bundles_post_ra>
// kernel: _residual_block_call.1
= control target key start
LH: loop header
LB: loop body
LE: loop exit
PB: predicated region body
PF: predicated region fallthrough
CT: control target
= control target key end

     0   :  { %10 = vsyncpa [#allocation3], 0  ;;  %s1310_s0 = inlined_call_operand.hbm [shape: f32[32,128], index: 0, kind: input, shape index: {}]   ;;  %s1311_s1 = inlined_call_operand.hbm [shape: f32[128,128], index: 1, kind: input, shape index: {}]   ;;  %s1312_s2 = inlined_call_operand.vmem [shape: f32[1,128], index: 2, kind: input, shape index: {}]   ;;  %s1313_s3 = inlined_call_operand.hbm [shape: f32[128,128], index: 3, kind: input, shape index: {}]   ;;  %s1314_s4 = inlined_call_operand.vmem [shape: f32[1,128], index: 4, kind: input, shape index: {}]   ;;  %s1315_s5 = inlined_call_operand.hbm [shape: f32[32,128], index: 5, kind: output, shape index: {}]  }
   0x1   :  { %12 = vsyncpa [#allocation3 + $0x1], 0 }
   0x2   :  { %13 = vsyncpa [#allocation6], 0 }
   0x3   :  { %14 = vsyncpa [#allocation4], 0 }
   0x4   :  { %16 = vsyncpa [#allocation4 + $0x1], 0  ;;  %s1049_s18 = smov 0   ;;  %s1051_s19 = smov 0  }
   0x5   :  { %s1053_s20 = smov 0   ;;  %s1055_s21 = smov 0  }
   0x6 LB: > { %s1070_s22 = sadd.s32 4294967295, %s1009_s21   ;;  %s590_s23 = sadd.s32 4294967294, %s1009_s21   ;;  %s1009_s21 = sphi %s1055_s21, %s1335_s21   ;;  %s1005_s20 = sphi %s1053_s20, %s1334_s20   ;;  %s1001_s19 = sphi %s1051_s19, %s1333_s19   ;;  %s997_s18 = sphi %s1049_s18, %s1332_s18  }
   0x7   : > { %p42_p0 = scmp.ne.s32.totalorder %s1001_s19, %s997_s18  ;;  %p1316_p1 = scmp.eq.s32.totalorder %s1070_s22, 0 }
   0x8   : > { %p156_p3 = scmp.eq.s32.totalorder %s590_s23, 1  ;;  %p591_p5 = scmp.ge.s32.totalorder %s1009_s21, 1 }
   0x9   : > { %p1079_p4 = por %p1316_p1, %p42_p0  ;;  %p163_p7 = scmp.lt.s32.totalorder %s1009_s21, 3 }
   0xa   : > { %p1084_p6 = por %p156_p3, %p42_p0  ;;  %s1011_s27 = smov [#allocation5]  }
   0xb   : > { %s1319_s24 = scalar_select %p1079_p4, 1, 0 }
   0xc   : > { %s1320_s25 = scalar_select %p1084_p6, 1, 0 }
   0xd   : > { %p1089_p8 = pnand %p591_p5, %p163_p7  ;;  %s175_s28 = sshll.u32 %s1011_s27, 4  ;;  %s1093_s28 = int_to_ptr.vmem [resolvable:$true] %s175_s28 }
   0xe   : > { %s1012_s30 = smov [#allocation7]   ;;  %s853_s9 = scalar_lea.hbm %s1311_s1, 2048 }
   0xf   : > { %p794_p9 = pneg %p1089_p8  ;;  %s191_s6 = sshll.u32 %s1012_s30, 4  ;;  %s1104_s6 = int_to_ptr.vmem [resolvable:$true] %s191_s6 }
  0x10   : > { %p854_p12 = scmp.ne.s32.totalorder %s1311_s1, %s853_s9  ;;  %p860_p5 = scmp.lt.u32.totalorder %s853_s9, %s1311_s1 }
  0x11   : > { %p1100_p11 = pnand %p794_p9, %p1316_p1 }
  0x13   : > { %p855_p13 = pneg %p1100_p11 }
  0x15   : > { %p856_p0 = pnand %p855_p13, %p854_p12 }
  0x17   : > { %p857_p3 = pneg %p856_p0 }
  0x19   : > { %p862_p7 = pnand %p860_p5, %p857_p3 }
  0x1b   : > { %865 = shalt.err (!%p862_p7)
}
  0x1c   : > { %s866_s14 = scalar_lea.vmem %s1093_s28, 2048  ;;  %p874_p2 = scmp.lt.s32.totalorder %s1093_s28, %s1093_s28 }
  0x1d   : > { %p867_p9 = scmp.ne.s32.totalorder %s1093_s28, %s866_s14  ;;  %p875_p12 = scmp.lt.s32.totalorder %s866_s14, %s866_s14 }
  0x1f   : > { %p869_p10 = pnand %p867_p9, %p855_p13  ;;  %p876_p0 = por %p875_p12, %p874_p2 }
  0x21   : > { %p870_p1 = pneg %p869_p10 }
  0x23   : > { %p877_p6 = pnand %p876_p0, %p870_p1 }
  0x25   : > { %880 = shalt.err (!%p877_p6)
}
  0x26   : > { %s1013_s15 = smov 128   ;;  %s1014_s16 = smov 8  }
  0x27   : > { %797 = dma.hbm_to_vmem [thread:$0]  (!%p1100_p11), %s1311_s1, 2048, %s1093_s28, [#allocation6], %s1013_s15, %s1013_s15, %s1014_s16  }
  0x28   : > { %s881_s7 = scalar_lea.hbm %s1313_s3, 2048 }
  0x29   : > { %p882_p1 = scmp.ne.s32.totalorder %s1313_s3, %s881_s7  ;;  %p888_p10 = scmp.lt.u32.totalorder %s881_s7, %s1313_s3 }
  0x2b   : > { %p884_p2 = pnand %p882_p1, %p855_p13 }
  0x2d   : > { %p885_p6 = pneg %p884_p2 }
  0x2f   : > { %p890_p3 = pnand %p888_p10, %p885_p6 }
  0x31   : > { %893 = shalt.err (!%p890_p3)
}
  0x32   : > { %s894_s28 = scalar_lea.vmem %s1104_s6, 2048  ;;  %p902_p12 = scmp.lt.s32.totalorder %s1104_s6, %s1104_s6 }
  0x33   : > { %p895_p5 = scmp.ne.s32.totalorder %s1104_s6, %s894_s28  ;;  %p903_p0 = scmp.lt.s32.totalorder %s894_s28, %s894_s28 }
  0x35   : > { %p897_p7 = pnand %p895_p5, %p855_p13  ;;  %p904_p1 = por %p903_p0, %p902_p12 }
  0x37   : > { %p898_p9 = pneg %p897_p7 }
  0x39   : > { %p905_p2 = pnand %p904_p1, %p898_p9 }
  0x3b   : > { %908 = shalt.err (!%p905_p2)
}
  0x3c   : > { %800 = dma.hbm_to_vmem [thread:$0]  (!%p1100_p11), %s1313_s3, 2048, %s1104_s6, [#allocation6], %s1013_s15, %s1013_s15, %s1014_s16  }
  0x3d   : > { %s1165_s29 = sadd.s32 1, %s1009_s21   ;;  %s29_s14 = sadd.s32 1, %s1005_s20 }
  0x3e   : > { %s26_s17 = ssub.s32 %s1009_s21, %s1165_s29  ;;  %p36_p13 = scmp.ne.s32.totalorder %s1005_s20, %s1001_s19 }
  0x3f   : > { %p27_p6 = scmp.eq.s32.totalorder %s26_s17, 0  ;;  %p37_p10 = scmp.eq.s32.totalorder %s1009_s21, 0 }
  0x40   : > { %p1323_p3 = scmp.eq.s32.totalorder %s1070_s22, 1  ;;  %p811_p7 = scmp.lt.s32.totalorder %s1009_s21, 2 }
  0x41   : > { %s1181_s27 = scalar_select %p27_p6, %s1005_s20, %s29_s14  }
  0x42   : > { %p1175_p5 = por %p1323_p3, %p36_p13  ;;  %p38_p9 = por %p37_p10, %p36_p13 }
  0x43   : > { %s208_s30 = sand.u32 1, %s1005_s20   ;;  %s610_s6 = sshll.u32 %s1009_s21, 8 }
  0x44   : > { %s1324_s23 = scalar_select %p1175_p5, 1, 0 }
  0x45   : > { %s595_s7 = sshll.u32 %s208_s30, 4  ;;  %s1188_s10 = scalar_lea.hbm %s1310_s0, %s610_s6 }
  0x46   : > { %s212_s11 = scalar_lea.vmem [#allocation2], %s595_s7  ;;  %p1192_p11 = pnand %p811_p7, %p38_p9 }
  0x47   : > { %s219_s28 = sshll.u32 %s212_s11, 4  ;;  %s1196_s13 = scalar_lea.sflag [#allocation3], %s208_s30  ;;  %s1190_s28 = int_to_ptr.vmem [resolvable:$true] %s219_s28 }
  0x48   : > { %s909_s14 = scalar_lea.hbm %s1188_s10, 256  ;;  %p911_p0 = pneg %p1192_p11 }
  0x49   : > { %p910_p12 = scmp.ne.s32.totalorder %s1188_s10, %s909_s14  ;;  %s914_s6 = scalar_lea.hbm %s1310_s0, 512 }
  0x4a   : > { %p915_p13 = scmp.lt.u32.totalorder %s1188_s10, %s1310_s0  ;;  %p916_p6 = scmp.lt.u32.totalorder %s914_s6, %s909_s14 }
  0x4b   : > { %p912_p1 = pnand %p911_p0, %p910_p12  ;;  %p918_p3 = scmp.lt.u32.totalorder %s909_s14, %s1188_s10 }
  0x4c   : > { %p917_p10 = por %p916_p6, %p915_p13 }
  0x4d   : > { %p913_p2 = pneg %p912_p1 }
  0x4e   : > { %p919_p7 = por %p918_p3, %p917_p10 }
  0x50   : > { %p920_p9 = pnand %p919_p7, %p913_p2 }
  0x52   : > { %923 = shalt.err (!%p920_p9)
}
  0x53   : > { %s924_s30 = scalar_lea.vmem %s1190_s28, 256  ;;  %s1015_s11 = smov [#allocation2]  }
  0x54   : > { %p925_p12 = scmp.ne.s32.totalorder %s1190_s28, %s924_s30  ;;  %s929_s17 = sshll.u32 %s1015_s11, 4  ;;  %s930_s17 = int_to_ptr.vmem [resolvable:$false] %s929_s17 }
  0x55   : > { %s931_s7 = scalar_lea.vmem %s930_s17, 512  ;;  %p932_p4 = scmp.lt.s32.totalorder %s1190_s28, %s930_s17 }
  0x56   : > { %p927_p1 = pnand %p925_p12, %p911_p0  ;;  %p933_p13 = scmp.lt.s32.totalorder %s931_s7, %s924_s30 }
  0x58   : > { %p928_p5 = pneg %p927_p1  ;;  %p934_p6 = por %p933_p13, %p932_p4 }
  0x5a   : > { %p935_p10 = pnand %p934_p6, %p928_p5 }
  0x5c   : > { %938 = shalt.err (!%p935_p10)
}
  0x5d   : > { %804 = dma.hbm_to_vmem [thread:$0]  (!%p1192_p11), %s1188_s10, 256, %s1190_s28, %s1196_s13, %s1013_s15, %s1013_s15, %s1014_s16  }
  0x5e   : > { %231 = sbr.rel (%p1089_p8) target bundleno = 596 (0x254), region = 40  ;;  %s1230_s14 = sand.u32 (!%p1089_p8), 1, %s1001_s19  }
  0x5f   : > { %s599_s6 = sshll.u32 (!%p1089_p8), %s1230_s14, 4  ;;  %s234_s8 = scalar_lea.sflag (!%p1089_p8), [#allocation3], %s1230_s14 }
  0x60   : > { %s1236_s12 = scalar_lea.vmem (!%p1089_p8), [#allocation2], %s599_s6  ;;  %p1326_p4 = scmp.ne.s32.totalorder (!%p1089_p8), %s1319_s24, 0 }
  0x65   : > { %984 = dma.done.wait (%p1326_p4), %s234_s8, 256  }
  0x66   : > { %986 = vsyncadd (%p1326_p4), %s234_s8, 4294967040  ;;  %p1327_p5 = scmp.eq.s32.totalorder %s1070_s22, 0 }
  0x68   : > { %988 = dma.done.wait (%p1327_p5), [#allocation6], 4096   ;;  %p1328_p8 = pmov %p1327_p5 }
  0x69   : > { %v276_v0 = vld [vmem:[#allocation5] sm:$0xff]  ;;  %v277_v1 = vld [vmem:[#allocation5 + $0x8] sm:$0xff]  ;;  %v278_v2 = vld [vmem:[#allocation5 + $0x10] sm:$0xff]  ;;  %s271_s10 = scalar_lea.vmem [#allocation8], %s599_s6  ;;  %s611_s13 = sshll.u32 %s1070_s22, 8 }
  0x6a   : > { %990 = vsyncadd (%p1328_p8), [#allocation6], 4294963200  ;;  %v718_v3 = vpack.c.bf16 %v277_v1, %v276_v0  ;;  %v279_v4 = vld [vmem:[#allocation5 + $0x18] sm:$0xff]  ;;  %v280_v6 = vld [vmem:[#allocation5 + $0x20] sm:$0xff]  ;;  %s498_s28 = sshll.u32 %s271_s10, 4  ;;  %s1266_s11 = scalar_lea.hbm %s1315_s5, %s611_s13  ;;  %s1261_s28 = int_to_ptr.vmem [resolvable:$true] %s498_s28 }
  0x6b   : > { %v722_v5 = vpack.c.bf16 %v279_v4, %v278_v2  ;;  %v281_v7 = vld [vmem:[#allocation5 + $0x28] sm:$0xff]  ;;  %v282_v9 = vld [vmem:[#allocation5 + $0x30] sm:$0xff]  ;;  %v283_v10 = vld [vmem:[#allocation5 + $0x38] sm:$0xff]  ;;  %s485_s17 = scalar_lea.sflag [#allocation4], %s1230_s14  ;;  %s939_s7 = scalar_lea.vmem %s1261_s28, 256 }
  0x6c   : > { %719 = vmatprep.subr.bf16.mxu0 %v718_v3  ;;  %v726_v8 = vpack.c.bf16 %v281_v7, %v280_v6  ;;  %v1247_v11 = vld [vmem:[%s1236_s12] sm:$0xff]  ;;  %v379_v13 = vld [vmem:[#allocation7 + $0x8] sm:$0xff]  ;;  %v381_v16 = vld [vmem:[#allocation7 + $0x18] sm:$0xff]  ;;  %v730_v20 = vpack.c.bf16 %v283_v10, %v282_v9  ;;  %p940_p11 = scmp.ne.s32.totalorder %s1261_s28, %s939_s7  ;;  %p1329_p0 = scmp.ne.s32.totalorder %s1324_s23, 0 }
  0x6d   : > { %721 = vmatpush3.bf16.msra.mxu0 %v718_v3  ;;  %680 = vmatprep.mubr.f32.mxu0 %v1247_v11  ;;  %v378_v12 = vld [vmem:[#allocation7] sm:$0xff]  ;;  %v380_v14 = vld [vmem:[#allocation7 + $0x10] sm:$0xff]  ;;  %v383_v19 = vld [vmem:[#allocation7 + $0x28] sm:$0xff]  ;;  %s1016_s22 = smov [#allocation8]  }
  0x6e   : > { %723 = vmatprep.subr.bf16.mxu0 %v722_v5  ;;  %v750_v15 = vpack.c.bf16 %v379_v13, %v378_v12  ;;  %v754_v17 = vpack.c.bf16 %v381_v16, %v380_v14  ;;  %v382_v18 = vld [vmem:[#allocation7 + $0x20] sm:$0xff]  ;;  %v285_v22 = vld [vmem:[#allocation5 + $0x48] sm:$0xff]  ;;  %v384_v24 = vld [vmem:[#allocation7 + $0x30] sm:$0xff]  ;;  %p941_p2 = pnand %p940_p11, %p1329_p0  ;;  %s943_s6 = sshll.u32 %s1016_s22, 4  ;;  %s944_s6 = int_to_ptr.vmem [resolvable:$false] %s943_s6 }
  0x6f   : > { %v284_v21 = vld [vmem:[#allocation5 + $0x40] sm:$0xff]  ;;  %v758_v23 = vpack.c.bf16 %v383_v19, %v382_v18  ;;  %v385_v25 = vld [vmem:[#allocation7 + $0x38] sm:$0xff]  ;;  %v286_v27 = vld [vmem:[#allocation5 + $0x50] sm:$0xff]  ;;  %s945_s8 = scalar_lea.vmem %s944_s6, 512  ;;  %p946_p7 = scmp.lt.s32.totalorder %s1261_s28, %s944_s6 }
  0x70   : > { %751 = vmatprep.subr.bf16.mxu1 %v750_v15  ;;  %v734_v26 = vpack.c.bf16 %v285_v22, %v284_v21  ;;  %v287_v28 = vld [vmem:[#allocation5 + $0x58] sm:$0xff]  ;;  %v762_v29 = vpack.c.bf16 %v385_v25, %v384_v24  ;;  %v386_v30 = vld [vmem:[#allocation7 + $0x40] sm:$0xff]  ;;  %v387_v31 = vld [vmem:[#allocation7 + $0x48] sm:$0xff]  ;;  %p942_p3 = pneg %p941_p2  ;;  %p947_p9 = scmp.lt.s32.totalorder %s945_s8, %s939_s7 }
  0x71   : > { %725 = vmatpush3.bf16.msra.mxu0 %v722_v5  ;;  %753 = vmatpush3.bf16.msra.mxu1 %v750_v15  ;;  %v738_v32 = vpack.c.bf16 %v287_v28, %v286_v27  ;;  %v288_v33 = vld [vmem:[#allocation5 + $0x60] sm:$0xff]  ;;  %v289_v34 = vld [vmem:[#allocation5 + $0x68] sm:$0xff]  ;;  %v766_v35 = vpack.c.bf16 %v387_v31, %v386_v30  ;;  %v388_v36 = vld [vmem:[#allocation7 + $0x50] sm:$0xff] }
  0x72   : > { %727 = vmatprep.subr.bf16.mxu0 %v726_v8  ;;  %755 = vmatprep.subr.bf16.mxu1 %v754_v17  ;;  %v389_v37 = vld [vmem:[#allocation7 + $0x58] sm:$0xff]  ;;  %v742_v38 = vpack.c.bf16 %v289_v34, %v288_v33  ;;  %v290_v39 = vld [vmem:[#allocation5 + $0x70] sm:$0xff]  ;;  %v390_v44 = vld [vmem:[#allocation7 + $0x60] sm:$0xff]  ;;  %p948_p12 = por %p947_p9, %p946_p7 }
  0x73   : > { %v291_v40 = vld [vmem:[#allocation5 + $0x78] sm:$0xff]  ;;  %v770_v41 = vpack.c.bf16 %v389_v37, %v388_v36  ;;  %v391_v45 = vld [vmem:[#allocation7 + $0x68] sm:$0xff]  ;;  %v392_v47 = vld [vmem:[#allocation7 + $0x70] sm:$0xff] }
  0x74   : > { %v746_v42 = vpack.c.bf16 %v291_v40, %v290_v39  ;;  %v275_v43 = vld [vmem:[%s1236_s12 + $0x8] sm:$0xff]  ;;  %v774_v46 = vpack.c.bf16 %v391_v45, %v390_v44  ;;  %v603_v50 = vld [vmem:[%s1312_s2] ss:$0 sm:$0xff]  ;;  %p949_p1 = pnand %p948_p12, %p942_p3 }
  0x75   : > { %729 = vmatpush3.bf16.msra.mxu0 %v726_v8  ;;  %757 = vmatpush3.bf16.msra.mxu1 %v754_v17  ;;  %v393_v48 = vld [vmem:[#allocation7 + $0x78] sm:$0xff]  ;;  %v604_v59 = vld [vmem:[%s1314_s4] ss:$0 sm:$0xff] }
  0x76   : > { %731 = vmatprep.subr.bf16.mxu0 %v730_v20  ;;  %759 = vmatprep.subr.bf16.mxu1 %v758_v23  ;;  %v778_v49 = vpack.c.bf16 %v393_v48, %v392_v47 }
  0x79   : > { %733 = vmatpush3.bf16.msra.mxu0 %v730_v20  ;;  %761 = vmatpush3.bf16.msra.mxu1 %v758_v23 }
  0x7a   : > { %735 = vmatprep.subr.bf16.mxu0 %v734_v26  ;;  %763 = vmatprep.subr.bf16.mxu1 %v762_v29 }
  0x7d   : > { %737 = vmatpush3.bf16.msra.mxu0 %v734_v26  ;;  %765 = vmatpush3.bf16.msra.mxu1 %v762_v29 }
  0x7e   : > { %739 = vmatprep.subr.bf16.mxu0 %v738_v32  ;;  %767 = vmatprep.subr.bf16.mxu1 %v766_v35 }
  0x81   : > { %741 = vmatpush3.bf16.msra.mxu0 %v738_v32  ;;  %769 = vmatpush3.bf16.msra.mxu1 %v766_v35 }
  0x82   : > { %743 = vmatprep.subr.bf16.mxu0 %v742_v38  ;;  %771 = vmatprep.subr.bf16.mxu1 %v770_v41 }
  0x85   : > { %745 = vmatpush3.bf16.msra.mxu0 %v742_v38  ;;  %773 = vmatpush3.bf16.msra.mxu1 %v770_v41 }
  0x86   : > { %747 = vmatprep.subr.bf16.mxu0 %v746_v42  ;;  %775 = vmatprep.subr.bf16.mxu1 %v774_v46 }
  0x89   : > { %749 = vmatpush3.bf16.msra.mxu0 %v746_v42  ;;  %777 = vmatpush3.bf16.msra.mxu1 %v774_v46 }
  0x8a   : > { %779 = vmatprep.subr.bf16.mxu1 %v778_v49 }
  0x8c   : > { %681 = vmatmul.mubr.f32.vlgmr.msra.gmra.mrb[0].mxu0 %v275_v43 }
  0x8d   : > { %781 = vmatpush3.bf16.msra.mxu1 %v778_v49 }
 0x15f   : > { %v682_v51 = vpop.f32.mrb[0].mxu0 }
 0x160   : > { %v371_v52 = vadd.f32 %v682_v51, %v603_v50  ;;  %v365_v53 = vpop.f32.mrb[1].mxu0 }
 0x161   : > { %v366_v54 = vadd.f32 %v603_v50, %v365_v53 }
 0x162   : > { %v375_v55 = vmul.f32 0.01, %v371_v52 }
 0x163   : > { %v374_v56 = vmul.f32 0.01, %v366_v54 }
 0x164   : > { %v377_v58 = vmax.f32 %v371_v52, %v375_v55 }
 0x165   : > { %v376_v57 = vmax.f32 %v366_v54, %v374_v56 }
 0x167   : > { %715 = vmatprep.mubr.f32.mxu1 %v376_v57 }
 0x168   : > { %716 = vmatmul.mubr.f32.vlgmr.msra.gmra.mrb[0].mxu1 %v377_v58 }
 0x23b   : > { %v717_v60 = vpop.f32.mrb[0].mxu1 }
 0x23c   : > { %v473_v61 = vadd.f32 %v717_v60, %v604_v59  ;;  %v467_v62 = vpop.f32.mrb[1].mxu1 }
 0x23d   : > { %v468_v63 = vadd.f32 %v604_v59, %v467_v62 }
 0x23e   : > { %v477_v0 = vadd.f32 %v473_v61, %v275_v43 }
 0x23f   : > { %v476_v1 = vadd.f32 %v468_v63, %v1247_v11 }
 0x240   : > { %v479_v2 = vmul.f32 0.01, %v477_v0 }
 0x241   : > { %v478_v3 = vmul.f32 0.01, %v476_v1 }
 0x242   : > { %v481_v4 = vmax.f32 %v477_v0, %v479_v2 }
 0x243   : > { %v480_v5 = vmax.f32 %v476_v1, %v478_v3 }
 0x244   : > { %483 = vst [vmem:[%s271_s10 + $0x8] sm:$0xff] %v481_v4 }
 0x245   : > { %482 = vst [vmem:[%s271_s10] sm:$0xff] %v480_v5 }
 0x246   : > { %952 = shalt.err (!%p949_p1)
}
 0x247   : > { %s953_s12 = scalar_lea.hbm %s1266_s11, 256  ;;  %s957_s15 = scalar_lea.hbm %s1315_s5, 512 }
 0x248   : > { %p954_p13 = scmp.ne.s32.totalorder %s1266_s11, %s953_s12  ;;  %p958_p4 = scmp.lt.u32.totalorder %s1266_s11, %s1315_s5 }
 0x249   : > { %p959_p5 = scmp.lt.u32.totalorder %s957_s15, %s953_s12  ;;  %p961_p11 = scmp.lt.u32.totalorder %s953_s12, %s1266_s11 }
 0x24a   : > { %p955_p6 = pnand %p954_p13, %p1329_p0 }
 0x24b   : > { %p960_p8 = por %p959_p5, %p958_p4 }
 0x24c   : > { %p956_p10 = pneg %p955_p6 }
 0x24d   : > { %p962_p2 = por %p961_p11, %p960_p8 }
 0x24f   : > { %p963_p3 = pnand %p962_p2, %p956_p10 }
 0x251   : > { %966 = shalt.err (!%p963_p3)
}
 0x252   : > { %s1017_s13 = smov 128   ;;  %s1018_s9 = smov 8  }
 0x253   : > { %792 = dma.vmem_to_hbm [thread:$0]  (%p1329_p0), %s1261_s28, 256, %s1266_s11, %s485_s17, %s1017_s13, %s1017_s13, %s1018_s9  }
 0x254 PF: > { %s513_s30 = sand.u32 1, %s997_s18   ;;  %p1330_p7 = scmp.ne.s32.totalorder %s1320_s25, 0 }
 0x255   : > { %p1331_p9 = scmp.ge.s32.totalorder %s1009_s21, 2  ;;  %s514_s7 = scalar_lea.sflag [#allocation4], %s513_s30 }
 0x257   : > { %p806_p12 = pnand %p1331_p9, %p1330_p7 }
 0x259   : > { %992 = dma.done.wait (!%p806_p12), %s514_s7, 256  }
 0x25a   : > { %994 = vsyncadd (!%p806_p12), %s514_s7, 4294967040  ;;  %p19_p1 = scmp.ge.s32.totalorder %s1165_s29, 4   ;;  %s1332_s18 = smov %s1001_s19 }
 0x25b   : > { %s1333_s19 = smov %s1005_s20  ;;  %s1334_s20 = smov %s1181_s27 }
 0x25c   : > { %s1335_s21 = smov %s1165_s29  ;;  %21 = sbr.rel (!%p19_p1) target bundleno = 6 (0x6), region = 93 }
 0x263   :  { %519 = vsyncpa [#allocation3], 1 }
 0x264   :  { %521 = vsyncpa [#allocation3 + $0x1], 1 }
 0x265   :  { %522 = vsyncpa [#allocation6], 1 }
 0x266   :  { %523 = vsyncpa [#allocation4], 1 }
 0x267   :  { %525 = vsyncpa [#allocation4 + $0x1], 1 }

// kernel: _residual_block_call.1
= control target key start
LH: loop header
LB: loop body
LE: loop exit
PB: predicated region body
PF: predicated region fallthrough
CT: control target
= control target key end

     0   :  { %10 = vsyncpa [#allocation3], 0  ;;  %s1310_s0 = inlined_call_operand.hbm [shape: f32[32,128], index: 0, kind: input, shape index: {}]   ;;  %s1311_s1 = inlined_call_operand.hbm [shape: f32[128,128], index: 1, kind: input, shape index: {}]   ;;  %s1312_s2 = inlined_call_operand.vmem [shape: f32[1,128], index: 2, kind: input, shape index: {}]   ;;  %s1313_s3 = inlined_call_operand.hbm [shape: f32[128,128], index: 3, kind: input, shape index: {}]   ;;  %s1314_s4 = inlined_call_operand.vmem [shape: f32[1,128], index: 4, kind: input, shape index: {}]   ;;  %s1315_s5 = inlined_call_operand.hbm [shape: f32[32,128], index: 5, kind: output, shape index: {}]  }
   0x1   :  { %12 = vsyncpa [#allocation3 + $0x1], 0 }
   0x2   :  { %13 = vsyncpa [#allocation6], 0 }
   0x3   :  { %14 = vsyncpa [#allocation4], 0 }
   0x4   :  { %16 = vsyncpa [#allocation4 + $0x1], 0  ;;  %s1049_s18 = smov 0   ;;  %s1051_s19 = smov 0  }
   0x5   :  { %s1053_s20 = smov 0   ;;  %s1055_s21 = smov 0  }
   0x6 LB: > { %s1070_s22 = sadd.s32 4294967295, %s1009_s21   ;;  %s590_s23 = sadd.s32 4294967294, %s1009_s21   ;;  %s1009_s21 = sphi %s1055_s21, %s1335_s21   ;;  %s1005_s20 = sphi %s1053_s20, %s1334_s20   ;;  %s1001_s19 = sphi %s1051_s19, %s1333_s19   ;;  %s997_s18 = sphi %s1049_s18, %s1332_s18  }
   0x7   : > { %p42_p0 = scmp.ne.s32.totalorder %s1001_s19, %s997_s18  ;;  %p1316_p1 = scmp.eq.s32.totalorder %s1070_s22, 0 }
   0x8   : > { %p156_p3 = scmp.eq.s32.totalorder %s590_s23, 1  ;;  %p591_p5 = scmp.ge.s32.totalorder %s1009_s21, 1 }
   0x9   : > { %p1079_p4 = por %p1316_p1, %p42_p0  ;;  %p163_p7 = scmp.lt.s32.totalorder %s1009_s21, 3 }
   0xa   : > { %p1084_p6 = por %p156_p3, %p42_p0  ;;  %s1011_s27 = smov [#allocation5]  }
   0xb   : > { %s1319_s24 = scalar_select %p1079_p4, 1, 0 }
   0xc   : > { %s1320_s25 = scalar_select %p1084_p6, 1, 0 }
   0xd   : > { %p1089_p8 = pnand %p591_p5, %p163_p7  ;;  %s175_s28 = sshll.u32 %s1011_s27, 4  ;;  %s1093_s28 = int_to_ptr.vmem [resolvable:$true] %s175_s28 }
   0xe   : > { %s1012_s30 = smov [#allocation7]   ;;  %s853_s9 = scalar_lea.hbm %s1311_s1, 2048 }
   0xf   : > { %p794_p9 = pneg %p1089_p8  ;;  %s191_s6 = sshll.u32 %s1012_s30, 4  ;;  %s1104_s6 = int_to_ptr.vmem [resolvable:$true] %s191_s6 }
  0x10   : > { %p854_p12 = scmp.ne.s32.totalorder %s1311_s1, %s853_s9  ;;  %p860_p5 = scmp.lt.u32.totalorder %s853_s9, %s1311_s1 }
  0x11   : > { %p1100_p11 = pnand %p794_p9, %p1316_p1 }
  0x13   : > { %p855_p13 = pneg %p1100_p11 }
  0x15   : > { %p856_p0 = pnand %p855_p13, %p854_p12 }
  0x17   : > { %p857_p3 = pneg %p856_p0 }
  0x19   : > { %p862_p7 = pnand %p860_p5, %p857_p3 }
  0x1b   : > { %865 = shalt.err (!%p862_p7)
}
  0x1c   : > { %s866_s14 = scalar_lea.vmem %s1093_s28, 2048  ;;  %p874_p2 = scmp.lt.s32.totalorder %s1093_s28, %s1093_s28 }
  0x1d   : > { %p867_p9 = scmp.ne.s32.totalorder %s1093_s28, %s866_s14  ;;  %p875_p12 = scmp.lt.s32.totalorder %s866_s14, %s866_s14 }
  0x1f   : > { %p869_p10 = pnand %p867_p9, %p855_p13  ;;  %p876_p0 = por %p875_p12, %p874_p2 }
  0x21   : > { %p870_p1 = pneg %p869_p10 }
  0x23   : > { %p877_p6 = pnand %p876_p0, %p870_p1 }
  0x25   : > { %880 = shalt.err (!%p877_p6)
}
  0x26   : > { %s1013_s15 = smov 128   ;;  %s1014_s16 = smov 8  }
  0x27   : > { %797 = dma.hbm_to_vmem [thread:$0]  (!%p1100_p11), %s1311_s1, 2048, %s1093_s28, [#allocation6], %s1013_s15, %s1013_s15, %s1014_s16  }
  0x28   : > { %s881_s7 = scalar_lea.hbm %s1313_s3, 2048 }
  0x29   : > { %p882_p1 = scmp.ne.s32.totalorder %s1313_s3, %s881_s7  ;;  %p888_p10 = scmp.lt.u32.totalorder %s881_s7, %s1313_s3 }
  0x2b   : > { %p884_p2 = pnand %p882_p1, %p855_p13 }
  0x2d   : > { %p885_p6 = pneg %p884_p2 }
  0x2f   : > { %p890_p3 = pnand %p888_p10, %p885_p6 }
  0x31   : > { %893 = shalt.err (!%p890_p3)
}
  0x32   : > { %s894_s28 = scalar_lea.vmem %s1104_s6, 2048  ;;  %p902_p12 = scmp.lt.s32.totalorder %s1104_s6, %s1104_s6 }
  0x33   : > { %p895_p5 = scmp.ne.s32.totalorder %s1104_s6, %s894_s28  ;;  %p903_p0 = scmp.lt.s32.totalorder %s894_s28, %s894_s28 }
  0x35   : > { %p897_p7 = pnand %p895_p5, %p855_p13  ;;  %p904_p1 = por %p903_p0, %p902_p12 }
  0x37   : > { %p898_p9 = pneg %p897_p7 }
  0x39   : > { %p905_p2 = pnand %p904_p1, %p898_p9 }
  0x3b   : > { %908 = shalt.err (!%p905_p2)
}
  0x3c   : > { %800 = dma.hbm_to_vmem [thread:$0]  (!%p1100_p11), %s1313_s3, 2048, %s1104_s6, [#allocation6], %s1013_s15, %s1013_s15, %s1014_s16  }
  0x3d   : > { %s1165_s29 = sadd.s32 1, %s1009_s21   ;;  %s29_s14 = sadd.s32 1, %s1005_s20 }
  0x3e   : > { %s26_s17 = ssub.s32 %s1009_s21, %s1165_s29  ;;  %p36_p13 = scmp.ne.s32.totalorder %s1005_s20, %s1001_s19 }
  0x3f   : > { %p27_p6 = scmp.eq.s32.totalorder %s26_s17, 0  ;;  %p37_p10 = scmp.eq.s32.totalorder %s1009_s21, 0 }
  0x40   : > { %p1323_p3 = scmp.eq.s32.totalorder %s1070_s22, 1  ;;  %p811_p7 = scmp.lt.s32.totalorder %s1009_s21, 2 }
  0x41   : > { %s1181_s27 = scalar_select %p27_p6, %s1005_s20, %s29_s14  }
  0x42   : > { %p1175_p5 = por %p1323_p3, %p36_p13  ;;  %p38_p9 = por %p37_p10, %p36_p13 }
  0x43   : > { %s208_s30 = sand.u32 1, %s1005_s20   ;;  %s610_s6 = sshll.u32 %s1009_s21, 8 }
  0x44   : > { %s1324_s23 = scalar_select %p1175_p5, 1, 0 }
  0x45   : > { %s595_s7 = sshll.u32 %s208_s30, 4  ;;  %s1188_s10 = scalar_lea.hbm %s1310_s0, %s610_s6 }
  0x46   : > { %s212_s11 = scalar_lea.vmem [#allocation2], %s595_s7  ;;  %p1192_p11 = pnand %p811_p7, %p38_p9 }
  0x47   : > { %s219_s28 = sshll.u32 %s212_s11, 4  ;;  %s1196_s13 = scalar_lea.sflag [#allocation3], %s208_s30  ;;  %s1190_s28 = int_to_ptr.vmem [resolvable:$true] %s219_s28 }
  0x48   : > { %s909_s14 = scalar_lea.hbm %s1188_s10, 256  ;;  %p911_p0 = pneg %p1192_p11 }
  0x49   : > { %p910_p12 = scmp.ne.s32.totalorder %s1188_s10, %s909_s14  ;;  %s914_s6 = scalar_lea.hbm %s1310_s0, 512 }
  0x4a   : > { %p915_p13 = scmp.lt.u32.totalorder %s1188_s10, %s1310_s0  ;;  %p916_p6 = scmp.lt.u32.totalorder %s914_s6, %s909_s14 }
  0x4b   : > { %p912_p1 = pnand %p911_p0, %p910_p12  ;;  %p918_p3 = scmp.lt.u32.totalorder %s909_s14, %s1188_s10 }
  0x4c   : > { %p917_p10 = por %p916_p6, %p915_p13 }
  0x4d   : > { %p913_p2 = pneg %p912_p1 }
  0x4e   : > { %p919_p7 = por %p918_p3, %p917_p10 }
  0x50   : > { %p920_p9 = pnand %p919_p7, %p913_p2 }
  0x52   : > { %923 = shalt.err (!%p920_p9)
}
  0x53   : > { %s924_s30 = scalar_lea.vmem %s1190_s28, 256  ;;  %s1015_s11 = smov [#allocation2]  }
  0x54   : > { %p925_p12 = scmp.ne.s32.totalorder %s1190_s28, %s924_s30  ;;  %s929_s17 = sshll.u32 %s1015_s11, 4  ;;  %s930_s17 = int_to_ptr.vmem [resolvable:$false] %s929_s17 }
  0x55   : > { %s931_s7 = scalar_lea.vmem %s930_s17, 512  ;;  %p932_p4 = scmp.lt.s32.totalorder %s1190_s28, %s930_s17 }
  0x56   : > { %p927_p1 = pnand %p925_p12, %p911_p0  ;;  %p933_p13 = scmp.lt.s32.totalorder %s931_s7, %s924_s30 }
  0x58   : > { %p928_p5 = pneg %p927_p1  ;;  %p934_p6 = por %p933_p13, %p932_p4 }
  0x5a   : > { %p935_p10 = pnand %p934_p6, %p928_p5 }
  0x5c   : > { %938 = shalt.err (!%p935_p10)
}
  0x5d   : > { %804 = dma.hbm_to_vmem [thread:$0]  (!%p1192_p11), %s1188_s10, 256, %s1190_s28, %s1196_s13, %s1013_s15, %s1013_s15, %s1014_s16  }
  0x5e   : > { %231 = sbr.rel (%p1089_p8) target bundleno = 596 (0x254), region = 40  ;;  %s1230_s14 = sand.u32 (!%p1089_p8), 1, %s1001_s19  }
  0x5f   : > { %s599_s6 = sshll.u32 (!%p1089_p8), %s1230_s14, 4  ;;  %s234_s8 = scalar_lea.sflag (!%p1089_p8), [#allocation3], %s1230_s14 }
  0x60   : > { %s1236_s12 = scalar_lea.vmem (!%p1089_p8), [#allocation2], %s599_s6  ;;  %p1326_p4 = scmp.ne.s32.totalorder (!%p1089_p8), %s1319_s24, 0 }
  0x65   : > { %984 = dma.done.wait (%p1326_p4), %s234_s8, 256  }
  0x66   : > { %986 = vsyncadd (%p1326_p4), %s234_s8, 4294967040  ;;  %p1327_p5 = scmp.eq.s32.totalorder %s1070_s22, 0 }
  0x68   : > { %988 = dma.done.wait (%p1327_p5), [#allocation6], 4096   ;;  %p1328_p8 = pmov %p1327_p5 }
  0x69   : > { %v276_v0 = vld [vmem:[#allocation5] sm:$0xff]  ;;  %v277_v1 = vld [vmem:[#allocation5 + $0x8] sm:$0xff]  ;;  %v278_v2 = vld [vmem:[#allocation5 + $0x10] sm:$0xff]  ;;  %s271_s10 = scalar_lea.vmem [#allocation8], %s599_s6  ;;  %s611_s13 = sshll.u32 %s1070_s22, 8 }
  0x6a   : > { %990 = vsyncadd (%p1328_p8), [#allocation6], 4294963200  ;;  %v718_v3 = vpack.c.bf16 %v277_v1, %v276_v0  ;;  %v279_v4 = vld [vmem:[#allocation5 + $0x18] sm:$0xff]  ;;  %v280_v6 = vld [vmem:[#allocation5 + $0x20] sm:$0xff]  ;;  %s498_s28 = sshll.u32 %s271_s10, 4  ;;  %s1266_s11 = scalar_lea.hbm %s1315_s5, %s611_s13  ;;  %s1261_s28 = int_to_ptr.vmem [resolvable:$true] %s498_s28 }
  0x6b   : > { %v722_v5 = vpack.c.bf16 %v279_v4, %v278_v2  ;;  %v281_v7 = vld [vmem:[#allocation5 + $0x28] sm:$0xff]  ;;  %v282_v9 = vld [vmem:[#allocation5 + $0x30] sm:$0xff]  ;;  %v283_v10 = vld [vmem:[#allocation5 + $0x38] sm:$0xff]  ;;  %s485_s17 = scalar_lea.sflag [#allocation4], %s1230_s14  ;;  %s939_s7 = scalar_lea.vmem %s1261_s28, 256 }
  0x6c   : > { %719 = vmatprep.subr.bf16.mxu0 %v718_v3  ;;  %v726_v8 = vpack.c.bf16 %v281_v7, %v280_v6  ;;  %v1247_v11 = vld [vmem:[%s1236_s12] sm:$0xff]  ;;  %v379_v13 = vld [vmem:[#allocation7 + $0x8] sm:$0xff]  ;;  %v381_v16 = vld [vmem:[#allocation7 + $0x18] sm:$0xff]  ;;  %v730_v20 = vpack.c.bf16 %v283_v10, %v282_v9  ;;  %p940_p11 = scmp.ne.s32.totalorder %s1261_s28, %s939_s7  ;;  %p1329_p0 = scmp.ne.s32.totalorder %s1324_s23, 0 }
  0x6d   : > { %721 = vmatpush3.bf16.msra.mxu0 %v718_v3  ;;  %680 = vmatprep.mubr.f32.mxu0 %v1247_v11  ;;  %v378_v12 = vld [vmem:[#allocation7] sm:$0xff]  ;;  %v380_v14 = vld [vmem:[#allocation7 + $0x10] sm:$0xff]  ;;  %v383_v19 = vld [vmem:[#allocation7 + $0x28] sm:$0xff]  ;;  %s1016_s22 = smov [#allocation8]  }
  0x6e   : > { %723 = vmatprep.subr.bf16.mxu0 %v722_v5  ;;  %v750_v15 = vpack.c.bf16 %v379_v13, %v378_v12  ;;  %v754_v17 = vpack.c.bf16 %v381_v16, %v380_v14  ;;  %v382_v18 = vld [vmem:[#allocation7 + $0x20] sm:$0xff]  ;;  %v285_v22 = vld [vmem:[#allocation5 + $0x48] sm:$0xff]  ;;  %v384_v24 = vld [vmem:[#allocation7 + $0x30] sm:$0xff]  ;;  %p941_p2 = pnand %p940_p11, %p1329_p0  ;;  %s943_s6 = sshll.u32 %s1016_s22, 4  ;;  %s944_s6 = int_to_ptr.vmem [resolvable:$false] %s943_s6 }
  0x6f   : > { %v284_v21 = vld [vmem:[#allocation5 + $0x40] sm:$0xff]  ;;  %v758_v23 = vpack.c.bf16 %v383_v19, %v382_v18  ;;  %v385_v25 = vld [vmem:[#allocation7 + $0x38] sm:$0xff]  ;;  %v286_v27 = vld [vmem:[#allocation5 + $0x50] sm:$0xff]  ;;  %s945_s8 = scalar_lea.vmem %s944_s6, 512  ;;  %p946_p7 = scmp.lt.s32.totalorder %s1261_s28, %s944_s6 }
  0x70   : > { %751 = vmatprep.subr.bf16.mxu1 %v750_v15  ;;  %v734_v26 = vpack.c.bf16 %v285_v22, %v284_v21  ;;  %v287_v28 = vld [vmem:[#allocation5 + $0x58] sm:$0xff]  ;;  %v762_v29 = vpack.c.bf16 %v385_v25, %v384_v24  ;;  %v386_v30 = vld [vmem:[#allocation7 + $0x40] sm:$0xff]  ;;  %v387_v31 = vld [vmem:[#allocation7 + $0x48] sm:$0xff]  ;;  %p942_p3 = pneg %p941_p2  ;;  %p947_p9 = scmp.lt.s32.totalorder %s945_s8, %s939_s7 }
  0x71   : > { %725 = vmatpush3.bf16.msra.mxu0 %v722_v5  ;;  %753 = vmatpush3.bf16.msra.mxu1 %v750_v15  ;;  %v738_v32 = vpack.c.bf16 %v287_v28, %v286_v27  ;;  %v288_v33 = vld [vmem:[#allocation5 + $0x60] sm:$0xff]  ;;  %v289_v34 = vld [vmem:[#allocation5 + $0x68] sm:$0xff]  ;;  %v766_v35 = vpack.c.bf16 %v387_v31, %v386_v30  ;;  %v388_v36 = vld [vmem:[#allocation7 + $0x50] sm:$0xff] }
  0x72   : > { %727 = vmatprep.subr.bf16.mxu0 %v726_v8  ;;  %755 = vmatprep.subr.bf16.mxu1 %v754_v17  ;;  %v389_v37 = vld [vmem:[#allocation7 + $0x58] sm:$0xff]  ;;  %v742_v38 = vpack.c.bf16 %v289_v34, %v288_v33  ;;  %v290_v39 = vld [vmem:[#allocation5 + $0x70] sm:$0xff]  ;;  %v390_v44 = vld [vmem:[#allocation7 + $0x60] sm:$0xff]  ;;  %p948_p12 = por %p947_p9, %p946_p7 }
  0x73   : > { %v291_v40 = vld [vmem:[#allocation5 + $0x78] sm:$0xff]  ;;  %v770_v41 = vpack.c.bf16 %v389_v37, %v388_v36  ;;  %v391_v45 = vld [vmem:[#allocation7 + $0x68] sm:$0xff]  ;;  %v392_v47 = vld [vmem:[#allocation7 + $0x70] sm:$0xff] }
  0x74   : > { %v746_v42 = vpack.c.bf16 %v291_v40, %v290_v39  ;;  %v275_v43 = vld [vmem:[%s1236_s12 + $0x8] sm:$0xff]  ;;  %v774_v46 = vpack.c.bf16 %v391_v45, %v390_v44  ;;  %v603_v50 = vld [vmem:[%s1312_s2] ss:$0 sm:$0xff]  ;;  %p949_p1 = pnand %p948_p12, %p942_p3 }
  0x75   : > { %729 = vmatpush3.bf16.msra.mxu0 %v726_v8  ;;  %757 = vmatpush3.bf16.msra.mxu1 %v754_v17  ;;  %v393_v48 = vld [vmem:[#allocation7 + $0x78] sm:$0xff]  ;;  %v604_v59 = vld [vmem:[%s1314_s4] ss:$0 sm:$0xff] }
  0x76   : > { %731 = vmatprep.subr.bf16.mxu0 %v730_v20  ;;  %759 = vmatprep.subr.bf16.mxu1 %v758_v23  ;;  %v778_v49 = vpack.c.bf16 %v393_v48, %v392_v47 }
  0x79   : > { %733 = vmatpush3.bf16.msra.mxu0 %v730_v20  ;;  %761 = vmatpush3.bf16.msra.mxu1 %v758_v23 }
  0x7a   : > { %735 = vmatprep.subr.bf16.mxu0 %v734_v26  ;;  %763 = vmatprep.subr.bf16.mxu1 %v762_v29 }
  0x7d   : > { %737 = vmatpush3.bf16.msra.mxu0 %v734_v26  ;;  %765 = vmatpush3.bf16.msra.mxu1 %v762_v29 }
  0x7e   : > { %739 = vmatprep.subr.bf16.mxu0 %v738_v32  ;;  %767 = vmatprep.subr.bf16.mxu1 %v766_v35 }
  0x81   : > { %741 = vmatpush3.bf16.msra.mxu0 %v738_v32  ;;  %769 = vmatpush3.bf16.msra.mxu1 %v766_v35 }
  0x82   : > { %743 = vmatprep.subr.bf16.mxu0 %v742_v38  ;;  %771 = vmatprep.subr.bf16.mxu1 %v770_v41 }
  0x85   : > { %745 = vmatpush3.bf16.msra.mxu0 %v742_v38  ;;  %773 = vmatpush3.bf16.msra.mxu1 %v770_v41 }
  0x86   : > { %747 = vmatprep.subr.bf16.mxu0 %v746_v42  ;;  %775 = vmatprep.subr.bf16.mxu1 %v774_v46 }
  0x89   : > { %749 = vmatpush3.bf16.msra.mxu0 %v746_v42  ;;  %777 = vmatpush3.bf16.msra.mxu1 %v774_v46 }
  0x8a   : > { %779 = vmatprep.subr.bf16.mxu1 %v778_v49 }
  0x8c   : > { %681 = vmatmul.mubr.f32.vlgmr.msra.gmra.mrb[0].mxu0 %v275_v43 }
  0x8d   : > { %781 = vmatpush3.bf16.msra.mxu1 %v778_v49 }
 0x15f   : > { %v682_v51 = vpop.f32.mrb[0].mxu0 }
 0x160   : > { %v371_v52 = vadd.f32 %v682_v51, %v603_v50  ;;  %v365_v53 = vpop.f32.mrb[1].mxu0 }
 0x161   : > { %v366_v54 = vadd.f32 %v603_v50, %v365_v53 }
 0x162   : > { %v375_v55 = vmul.f32 0.01, %v371_v52 }
 0x163   : > { %v374_v56 = vmul.f32 0.01, %v366_v54 }
 0x164   : > { %v377_v58 = vmax.f32 %v371_v52, %v375_v55 }
 0x165   : > { %v376_v57 = vmax.f32 %v366_v54, %v374_v56 }
 0x167   : > { %715 = vmatprep.mubr.f32.mxu1 %v376_v57 }
 0x168   : > { %716 = vmatmul.mubr.f32.vlgmr.msra.gmra.mrb[0].mxu1 %v377_v58 }
 0x23b   : > { %v717_v60 = vpop.f32.mrb[0].mxu1 }
 0x23c   : > { %v473_v61 = vadd.f32 %v717_v60, %v604_v59  ;;  %v467_v62 = vpop.f32.mrb[1].mxu1 }
 0x23d   : > { %v468_v63 = vadd.f32 %v604_v59, %v467_v62 }
 0x23e   : > { %v477_v0 = vadd.f32 %v473_v61, %v275_v43 }
 0x23f   : > { %v476_v1 = vadd.f32 %v468_v63, %v1247_v11 }
 0x240   : > { %v479_v2 = vmul.f32 0.01, %v477_v0 }
 0x241   : > { %v478_v3 = vmul.f32 0.01, %v476_v1 }
 0x242   : > { %v481_v4 = vmax.f32 %v477_v0, %v479_v2 }
 0x243   : > { %v480_v5 = vmax.f32 %v476_v1, %v478_v3 }
 0x244   : > { %483 = vst [vmem:[%s271_s10 + $0x8] sm:$0xff] %v481_v4 }
 0x245   : > { %482 = vst [vmem:[%s271_s10] sm:$0xff] %v480_v5 }
 0x246   : > { %952 = shalt.err (!%p949_p1)
}
 0x247   : > { %s953_s12 = scalar_lea.hbm %s1266_s11, 256  ;;  %s957_s15 = scalar_lea.hbm %s1315_s5, 512 }
 0x248   : > { %p954_p13 = scmp.ne.s32.totalorder %s1266_s11, %s953_s12  ;;  %p958_p4 = scmp.lt.u32.totalorder %s1266_s11, %s1315_s5 }
 0x249   : > { %p959_p5 = scmp.lt.u32.totalorder %s957_s15, %s953_s12  ;;  %p961_p11 = scmp.lt.u32.totalorder %s953_s12, %s1266_s11 }
 0x24a   : > { %p955_p6 = pnand %p954_p13, %p1329_p0 }
 0x24b   : > { %p960_p8 = por %p959_p5, %p958_p4 }
 0x24c   : > { %p956_p10 = pneg %p955_p6 }
 0x24d   : > { %p962_p2 = por %p961_p11, %p960_p8 }
 0x24f   : > { %p963_p3 = pnand %p962_p2, %p956_p10 }
 0x251   : > { %966 = shalt.err (!%p963_p3)
}
 0x252   : > { %s1017_s13 = smov 128   ;;  %s1018_s9 = smov 8  }
 0x253   : > { %792 = dma.vmem_to_hbm [thread:$0]  (%p1329_p0), %s1261_s28, 256, %s1266_s11, %s485_s17, %s1017_s13, %s1017_s13, %s1018_s9  }
 0x254 PF: > { %s513_s30 = sand.u32 1, %s997_s18   ;;  %p1330_p7 = scmp.ne.s32.totalorder %s1320_s25, 0 }
 0x255   : > { %p1331_p9 = scmp.ge.s32.totalorder %s1009_s21, 2  ;;  %s514_s7 = scalar_lea.sflag [#allocation4], %s513_s30 }
 0x257   : > { %p806_p12 = pnand %p1331_p9, %p1330_p7 }
 0x259   : > { %992 = dma.done.wait (!%p806_p12), %s514_s7, 256  }
 0x25a   : > { %994 = vsyncadd (!%p806_p12), %s514_s7, 4294967040  ;;  %p19_p1 = scmp.ge.s32.totalorder %s1165_s29, 4   ;;  %s1332_s18 = smov %s1001_s19 }
 0x25b   : > { %s1333_s19 = smov %s1005_s20  ;;  %s1334_s20 = smov %s1181_s27 }
 0x25c   : > { %s1335_s21 = smov %s1165_s29  ;;  %21 = sbr.rel (!%p19_p1) target bundleno = 6 (0x6), region = 93 }
 0x263   :  { %519 = vsyncpa [#allocation3], 1 }
 0x264   :  { %521 = vsyncpa [#allocation3 + $0x1], 1 }
 0x265   :  { %522 = vsyncpa [#allocation6], 1 }
 0x266   :  { %523 = vsyncpa [#allocation4], 1 }
 0x267   :  { %525 = vsyncpa [#allocation4 + $0x1], 1 }

</bundles_post_ra>
